<compile_context>
chip_gen: v6e
topology: v6e:2x2x1
jax: 0.10.0
libtpu: 0.0.40
codegen_flags: <defaults>
</compile_context>

<pallas_src>
import jax
import jax.numpy as jnp
from jax.experimental import pallas as pl
from jax.experimental.pallas import tpu as pltpu


# ----------------------------- Pallas kernel ------------------------------- #

def _make_sa_kernel(num_layers, s_chunk, tile_p, group):
    """group: number of samples whose rows are fed to one last-layer matmul
    (M = group*tile_p), then VPU-maxed into the (tile_p, C_last) accumulator."""

    def kernel(feats_ref, *rest):
        param_refs = rest[:2 * num_layers]
        out_ref = rest[2 * num_layers]
        k = pl.program_id(2)                              # nsample-chunk (reduction) axis

        x = feats_ref[0]                                  # (s_chunk, tile_p, C_in) bf16
        c_in = x.shape[-1]
        # relayout-free merge needs tile_p % 16 == 0 (bf16 sublane packing) or
        # tile_p == npoint (full-extent block); _choose_tiling guarantees this.
        h = x.reshape(s_chunk * tile_p, c_in)

        # layers 0 .. L-2 over the whole chunk (bf16 MXU, f32 accumulate)
        for l in range(num_layers - 1):
            w = param_refs[2 * l][...]                    # bf16 (C_prev, C_l)
            b = param_refs[2 * l + 1][...]                # f32  (1, C_l)
            y = jnp.dot(h, w, preferred_element_type=jnp.float32) + b
            h = jnp.maximum(y, 0.0).astype(jnp.bfloat16)  # ReLU in f32, re-cast for next MXU op

        # last layer: grouped matmuls (M = group*tile_p) fused with a VPU max
        w = param_refs[2 * (num_layers - 1)][...]
        b = param_refs[2 * (num_layers - 1) + 1][...]

        acc = None                                        # (tile_p, C_last) f32
        for g0 in range(0, s_chunk, group):
            gs = min(group, s_chunk - g0)
            hs = h[g0 * tile_p:(g0 + gs) * tile_p, :]     # (gs*tile_p, C_prev) bf16
            y = jnp.dot(hs, w, preferred_element_type=jnp.float32) + b
            y = jnp.maximum(y, 0.0)                       # ReLU, f32
            m = y[0:tile_p]
            for s in range(1, gs):                        # VPU max over the gs slabs
                m = jnp.maximum(m, y[s * tile_p:(s + 1) * tile_p])
            acc = m if acc is None else jnp.maximum(acc, m)

        # output block (1, tile_p, C_last) is resident across the k axis:
        # running max accumulator, no in-kernel transpose.
        @pl.when(k == 0)
        def _():
            out_ref[0] = acc

        @pl.when(k != 0)
        def _():
            out_ref[0] = jnp.maximum(out_ref[0], acc)

    return kernel


# ------------------------- tiling / VMEM sizing ----------------------------- #

def _lane(c):
    return ((c + 127) // 128) * 128


def _sub(r, m):
    return ((r + m - 1) // m) * m


def _tpu_generation_defaults():
    """(vmem_limit_bytes, target_m): generation-aware VMEM ceiling and MXU M/N target."""
    cap = 128 << 20
    try:
        cap = int(pltpu.get_tpu_info().vmem_capacity_bytes)
    except Exception:
        pass
    kind = ""
    try:
        kind = jax.devices()[0].device_kind.lower()
    except Exception:
        pass
    target_m = 128 if "v5" in kind else 256               # v5e MXU is 4x128x128
    vmem_limit = (cap * 3) // 4                           # ~96 MiB on 128 MiB, ~48 MiB on 64 MiB
    return vmem_limit, target_m


def _estimate_vmem(tile_p, s_chunk, c_in, mlp_channels, group):
    """Lane-/sublane-padding aware per-step VMEM estimate (bytes)."""
    rows = s_chunk * tile_p
    chans = [c_in] + list(mlp_channels)
    c_mid = max(chans)
    c_last = mlp_channels[-1]
    est = 0
    # double-buffered bf16 feats block
    est += 2 * s_chunk * _sub(tile_p, 16) * _lane(c_in) * 2
    # double-buffered weight (bf16) + bias (f32) blocks
    for cp, cl in zip(chans[:-1], chans[1:]):
        est += 2 * _sub(cp, 16) * _lane(cl) * 2
        est += 2 * 8 * _lane(cl) * 4
    # widest f32 intermediate y + bf16 h of the hidden layers
    est += _sub(rows, 8) * _lane(c_mid) * 4
    est += _sub(rows, 16) * _lane(c_mid) * 2
    # grouped last-layer f32 transient + running max accumulator
    est += group * _sub(tile_p, 8) * _lane(c_last) * 4
    est += _sub(tile_p, 8) * _lane(c_last) * 4
    # double-buffered f32 output block
    est += 2 * _sub(tile_p, 8) * _lane(c_last) * 4
    return est


def _choose_tiling(npoint, nsample, c_in, mlp_channels, budget_bytes, target_m):
    """Pick (tile_p, s_chunk, group): tile_p prefers multiples of 128 near target_m;
    s_chunk is the largest divisor of nsample whose working set fits the budget."""
    mults = [tp for tp in range(128, npoint + 1, 128) if npoint % tp == 0]
    mults.sort(key=lambda tp: (abs(tp - target_m), -tp))
    small = [tp for tp in (64, 32, 16) if tp < npoint and npoint % tp == 0]
    cands, seen = [], set()
    for tp in mults + small + [npoint]:                   # full-extent block always legal
        if tp not in seen:
            seen.add(tp)
            cands.append(tp)
    s_divs = [s for s in range(nsample, 0, -1) if nsample % s == 0]
    for tp in cands:
        group_cap = max(1, target_m // tp)
        for sc in s_divs:
            g = min(sc, group_cap)
            if _estimate_vmem(tp, sc, c_in, mlp_channels, g) <= budget_bytes:
                return tp, sc, g
    return cands[-1], 1, 1


# ----------------------------- pallas_call wrapper --------------------------- #

def pointnet_sa_mlp_max(feats, weights, biases, npoint, nsample,
                        tile_p, s_chunk, group, vmem_limit):
    """feats: (B, nsample, npoint, C_in) bf16 -> (B, npoint, C_last) f32 (channels-last)."""
    B, S, P, c_in = feats.shape
    assert S == nsample and P == npoint
    assert npoint % tile_p == 0 and nsample % s_chunk == 0
    num_layers = len(weights)
    c_last = weights[-1].shape[1]
    kernel = _make_sa_kernel(num_layers, s_chunk, tile_p, group)

    n_ptile = npoint // tile_p
    n_k = nsample // s_chunk

    # v7x megacore: put the longer parallel axis first. The reduction (k) axis
    # is always last (innermost), so the output block stays resident across it.
    p_major = n_ptile >= B
    if p_major:
        grid = (n_ptile, B, n_k)
        fmap = lambda p, b, k: (b, k, p, 0)
        omap = lambda p, b, k: (b, p, 0)
        pmap = lambda p, b, k: (0, 0)
    else:
        grid = (B, n_ptile, n_k)
        fmap = lambda b, p, k: (b, k, p, 0)
        omap = lambda b, p, k: (b, p, 0)
        pmap = lambda b, p, k: (0, 0)

    in_specs = [pl.BlockSpec((1, s_chunk, tile_p, c_in), fmap)]
    params = []
    for w, bias in zip(weights, biases):
        in_specs.append(pl.BlockSpec(w.shape, pmap))
        in_specs.append(pl.BlockSpec(bias.shape, pmap))
        params.extend([w, bias])

    return pl.pallas_call(
        kernel,
        out_shape=jax.ShapeDtypeStruct((B, npoint, c_last), jnp.float32),
        grid=grid,
        in_specs=in_specs,
        out_specs=pl.BlockSpec((1, tile_p, c_last), omap),
        compiler_params=pltpu.CompilerParams(
            dimension_semantics=("parallel", "parallel", "arbitrary"),
            vmem_limit_bytes=int(vmem_limit)),
    )(feats, *params)


# ------------------------------- JAX glue ----------------------------------- #

def furthest_point_sample(xyz_cl, npoint):
    """xyz_cl: (B, N, 3) -> (B, npoint) int32 (iterative FPS, start at 0)."""
    # TODO(synk): sequential argmax-over-N loop; for realistic N (>=16K) this
    # dominates wall clock and needs its own batched/kernelized strategy.
    B, N, _ = xyz_cl.shape

    def body(i, state):
        idxs, dists, farthest = state
        idxs = idxs.at[:, i].set(farthest)
        centroid = jnp.take_along_axis(xyz_cl, farthest[:, None, None], axis=1)
        d = jnp.sum((xyz_cl - centroid) ** 2, axis=-1)
        dists = jnp.minimum(dists, d)
        farthest = jnp.argmax(dists, axis=-1).astype(jnp.int32)
        return idxs, dists, farthest

    idxs0 = jnp.zeros((B, npoint), jnp.int32)
    dists0 = jnp.full((B, N), 1e10, jnp.float32)
    far0 = jnp.zeros((B,), jnp.int32)
    idxs, _, _ = jax.lax.fori_loop(0, npoint, body, (idxs0, dists0, far0))
    return idxs


def ball_query(radius, nsample, xyz_cl, new_xyz_cl):
    """xyz (B,N,3), centers (B,npoint,3) -> (B,npoint,nsample) int32 indices."""
    # TODO(synk): full (B,npoint,N) distance matrix + sort; for large N replace
    # with a masked partial top-k / bucketed selection.
    B, N, _ = xyz_cl.shape
    npoint = new_xyz_cl.shape[1]
    d2 = jnp.sum((new_xyz_cl[:, :, None, :] - xyz_cl[:, None, :, :]) ** 2,
                 axis=-1)                                            # (B, npoint, N)
    ar = jnp.broadcast_to(jnp.arange(N, dtype=jnp.int32), (B, npoint, N))
    idx = jnp.where(d2 < radius * radius, ar, N)
    idx = jnp.sort(idx, axis=-1)[:, :, :nsample]
    first = idx[:, :, 0:1]
    idx = jnp.where(idx == N, first, idx)                            # pad with first hit
    idx = jnp.where(idx == N, 0, idx)                                # degenerate: no hit at all
    return idx.astype(jnp.int32)


def init_params(key, in_channel, mlp):
    """Conv2d(1x1) + BatchNorm2d params per layer, folded to (W_fold bf16, b_fold f32)."""
    # TODO(synk): BatchNorm2d is applied in eval mode (running stats folded into
    # the conv); training-mode batch statistics are not implemented.
    eps = 1e-5
    weights, biases = [], []
    last = in_channel
    for i, out_c in enumerate(mlp):
        k = jax.random.fold_in(key, i)
        k1, k2, k3, k4, k5, k6 = jax.random.split(k, 6)
        w = jax.random.normal(k1, (last, out_c), jnp.float32) * 0.1      # Conv2d 1x1 (Cin, Cout)
        b_conv = jax.random.normal(k2, (out_c,), jnp.float32) * 0.1
        gamma = jax.random.uniform(k3, (out_c,), jnp.float32, 0.5, 1.5)
        beta = jax.random.normal(k4, (out_c,), jnp.float32) * 0.1
        r_mean = jax.random.normal(k5, (out_c,), jnp.float32) * 0.1
        r_var = jax.random.uniform(k6, (out_c,), jnp.float32, 0.5, 1.5)
        scale = gamma / jnp.sqrt(r_var + eps)
        w_fold = (w * scale[None, :]).astype(jnp.bfloat16)               # bf16 MXU operand
        b_fold = (b_conv - r_mean) * scale + beta                        # f32 bias
        weights.append(w_fold)
        biases.append(b_fold.reshape(1, out_c))
        last = out_c
    return weights, biases


def pointnet_set_abstraction(xyz, points, weights, biases, npoint, radius, nsample):
    """group_all=False forward. xyz (B,3,N), points (B,D,N) ->
       (new_xyz (B,3,npoint), new_features (B,C_last,npoint), feats)."""
    B, _, N = xyz.shape
    xyz_cl = jnp.transpose(xyz, (0, 2, 1))                               # (B, N, 3)

    fps_idx = furthest_point_sample(xyz_cl, npoint)                      # (B, npoint)
    new_xyz = jnp.take_along_axis(xyz, fps_idx[:, None, :], axis=2)      # (B, 3, npoint)
    new_xyz_cl = jnp.take_along_axis(xyz_cl, fps_idx[:, :, None], axis=1)  # (B, npoint, 3)
    idx = ball_query(radius, nsample, xyz_cl, new_xyz_cl)                # (B, npoint, nsample)

    # TODO(synk): fuse this gather + center subtraction into the Pallas kernel
    # (PrefetchScalarGridSpec indices in SMEM + allpts in pl.ANY) to avoid the
    # full HBM write + re-read of the grouped (B, nsample, npoint, C_in) tensor.
    if points is not None:
        points_cl = jnp.transpose(points, (0, 2, 1))                     # (B, N, D)
        allpts = jnp.concatenate([xyz_cl, points_cl], axis=-1)           # (B, N, 3+D)
    else:
        allpts = xyz_cl
    c_in = allpts.shape[-1]
    # channels-last gather, sample-major row order (row = s*npoint + p)
    idx_sm = jnp.transpose(idx, (0, 2, 1)).reshape(B, nsample * npoint)  # (B, S*P) int32
    gathered = jnp.take_along_axis(allpts, idx_sm[:, :, None], axis=1)   # (B, S*P, C_in)
    gathered = gathered.reshape(B, nsample, npoint, c_in)
    # subtract ball centers from the xyz channels only (zeros for point feats)
    center_pad = jnp.concatenate(
        [new_xyz_cl, jnp.zeros((B, npoint, c_in - 3), allpts.dtype)], axis=-1)
    feats = (gathered - center_pad[:, None, :, :]).astype(jnp.bfloat16)  # (B, S, P, C_in)

    vmem_limit, target_m = _tpu_generation_defaults()
    budget = int(vmem_limit * 0.85)                                      # headroom for compiler scratch
    tile_p, s_chunk, group = _choose_tiling(
        npoint, nsample, c_in, [w.shape[1] for w in weights], budget, target_m)

    new_feat_cl = pointnet_sa_mlp_max(feats, weights, biases, npoint, nsample,
                                      tile_p, s_chunk, group, vmem_limit)
    # single cheap layout transpose on the small final tensor (XLA, not in-kernel)
    new_features = jnp.transpose(new_feat_cl, (0, 2, 1))                 # (B, C_last, npoint)
    return new_xyz, new_features, feats


if __name__ == "__main__":
    key = jax.random.PRNGKey(0)
    B, N, D = 2, 64, 4
    npoint, radius, nsample = 16, 0.8, 8
    mlp = [16, 32]
    in_channel = 3 + D

    kx, kp, kw = jax.random.split(key, 3)
    xyz = jax.random.normal(kx, (B, 3, N), jnp.float32)
    points = jax.random.normal(kp, (B, D, N), jnp.float32)
    weights, biases = init_params(kw, in_channel, mlp)

    new_xyz, new_features, feats = pointnet_set_abstraction(
        xyz, points, weights, biases, npoint, radius, nsample)
    jax.block_until_ready((new_xyz, new_features))

    # plain-JAX reference for the MLP + max hot path (same bf16-in / f32-acc math)
    h = feats.astype(jnp.float32)                                        # (B, S, P, C_in)
    for w, b in zip(weights, biases):
        y = jnp.matmul(h.astype(jnp.bfloat16), w,
                       preferred_element_type=jnp.float32) + b
        h = jnp.maximum(y, 0.0)
    ref = jnp.max(h, axis=1)                                             # (B, P, C_last)
    ref = jnp.transpose(ref, (0, 2, 1))                                  # (B, C_last, P)

    assert new_xyz.shape == (B, 3, npoint)
    assert new_features.shape == (B, mlp[-1], npoint)
    assert jnp.allclose(new_features, ref, atol=1e-2, rtol=1e-2), "mismatch vs reference"
    print("KERNEL_OK")
</pallas_src>

<mosaic_0001>
module attributes {stable_mosaic.version = 11 : i64} {
  func.func @kernel(%arg0: i32, %arg1: i32, %arg2: i32, %arg3: memref<1x8x16x7xbf16, #tpu.memory_space<vmem>>, %arg4: memref<7x16xbf16, #tpu.memory_space<vmem>>, %arg5: memref<1x16xf32, #tpu.memory_space<vmem>>, %arg6: memref<16x32xbf16, #tpu.memory_space<vmem>>, %arg7: memref<1x32xf32, #tpu.memory_space<vmem>>, %arg8: memref<1x16x32xf32, #tpu.memory_space<vmem>>) attributes {dimension_semantics = [#tpu.dimension_semantics<parallel>, #tpu.dimension_semantics<parallel>, #tpu.dimension_semantics<arbitrary>], iteration_bounds = array<i64: 2, 1, 1>, scalar_prefetch = 0 : i64, scratch_operands = 0 : i64, tpu.core_type = #tpu.core_type<tc>, window_params = [{transform_indices = @transform_0, window_bounds = array<i64: 1, 8, 16, 7>}, {pipeline_mode = #tpu.pipeline_mode<synchronous>, transform_indices = @transform_1, window_bounds = array<i64: 7, 16>}, {pipeline_mode = #tpu.pipeline_mode<synchronous>, transform_indices = @transform_2, window_bounds = array<i64: 1, 16>}, {pipeline_mode = #tpu.pipeline_mode<synchronous>, transform_indices = @transform_3, window_bounds = array<i64: 16, 32>}, {pipeline_mode = #tpu.pipeline_mode<synchronous>, transform_indices = @transform_4, window_bounds = array<i64: 1, 32>}, {transform_indices = @transform_5, window_bounds = array<i64: 1, 16, 32>}]} {
    %c0 = arith.constant 0 : index
    %c0_0 = arith.constant 0 : index
    %c0_1 = arith.constant 0 : index
    %c0_2 = arith.constant 0 : index
    %0 = vector.load %arg3[%c0, %c0_0, %c0_1, %c0_2] : memref<1x8x16x7xbf16, #tpu.memory_space<vmem>>, vector<1x8x16x7xbf16>
    %1 = vector.shape_cast %0 : vector<1x8x16x7xbf16> to vector<8x16x7xbf16>
    %2 = vector.shape_cast %1 : vector<8x16x7xbf16> to vector<128x7xbf16>
    %c0_3 = arith.constant 0 : index
    %c0_4 = arith.constant 0 : index
    %3 = vector.load %arg4[%c0_3, %c0_4] : memref<7x16xbf16, #tpu.memory_space<vmem>>, vector<7x16xbf16>
    %c0_5 = arith.constant 0 : index
    %c0_6 = arith.constant 0 : index
    %4 = vector.load %arg5[%c0_5, %c0_6] : memref<1x16xf32, #tpu.memory_space<vmem>>, vector<1x16xf32>
    %cst = arith.constant dense<0.000000e+00> : vector<128x16xf32>
    %5 = tpu.matmul %2, %3, %cst {dimension_numbers = #tpu.dot_dimension_numbers<[1], [0], [0], [1], [0, 0, 1, 1], [], []>} : vector<128x7xbf16>, vector<7x16xbf16>, vector<128x16xf32> -> vector<128x16xf32>
    %6 = vector.broadcast %4 : vector<1x16xf32> to vector<128x16xf32>
    %7 = arith.addf %5, %6 : vector<128x16xf32>
    %cst_7 = arith.constant 0.000000e+00 : f32
    %8 = vector.broadcast %cst_7 : f32 to vector<128x16xf32>
    %9 = arith.maximumf %7, %8 : vector<128x16xf32>
    %10 = arith.truncf %9 : vector<128x16xf32> to vector<128x16xbf16>
    %c0_8 = arith.constant 0 : index
    %c0_9 = arith.constant 0 : index
    %11 = vector.load %arg6[%c0_8, %c0_9] : memref<16x32xbf16, #tpu.memory_space<vmem>>, vector<16x32xbf16>
    %c0_10 = arith.constant 0 : index
    %c0_11 = arith.constant 0 : index
    %12 = vector.load %arg7[%c0_10, %c0_11] : memref<1x32xf32, #tpu.memory_space<vmem>>, vector<1x32xf32>
    %cst_12 = arith.constant dense<0.000000e+00> : vector<128x32xf32>
    %13 = tpu.matmul %10, %11, %cst_12 {dimension_numbers = #tpu.dot_dimension_numbers<[1], [0], [0], [1], [0, 0, 1, 1], [], []>} : vector<128x16xbf16>, vector<16x32xbf16>, vector<128x32xf32> -> vector<128x32xf32>
    %14 = vector.broadcast %12 : vector<1x32xf32> to vector<128x32xf32>
    %15 = arith.addf %13, %14 : vector<128x32xf32>
    %cst_13 = arith.constant 0.000000e+00 : f32
    %16 = vector.broadcast %cst_13 : f32 to vector<128x32xf32>
    %17 = arith.maximumf %15, %16 : vector<128x32xf32>
    %18 = vector.extract_strided_slice %17 {offsets = [0, 0], sizes = [16, 32], strides = [1, 1]} : vector<128x32xf32> to vector<16x32xf32>
    %19 = vector.extract_strided_slice %17 {offsets = [16, 0], sizes = [16, 32], strides = [1, 1]} : vector<128x32xf32> to vector<16x32xf32>
    %20 = arith.maximumf %18, %19 : vector<16x32xf32>
    %21 = vector.extract_strided_slice %17 {offsets = [32, 0], sizes = [16, 32], strides = [1, 1]} : vector<128x32xf32> to vector<16x32xf32>
    %22 = arith.maximumf %20, %21 : vector<16x32xf32>
    %23 = vector.extract_strided_slice %17 {offsets = [48, 0], sizes = [16, 32], strides = [1, 1]} : vector<128x32xf32> to vector<16x32xf32>
    %24 = arith.maximumf %22, %23 : vector<16x32xf32>
    %25 = vector.extract_strided_slice %17 {offsets = [64, 0], sizes = [16, 32], strides = [1, 1]} : vector<128x32xf32> to vector<16x32xf32>
    %26 = arith.maximumf %24, %25 : vector<16x32xf32>
    %27 = vector.extract_strided_slice %17 {offsets = [80, 0], sizes = [16, 32], strides = [1, 1]} : vector<128x32xf32> to vector<16x32xf32>
    %28 = arith.maximumf %26, %27 : vector<16x32xf32>
    %29 = vector.extract_strided_slice %17 {offsets = [96, 0], sizes = [16, 32], strides = [1, 1]} : vector<128x32xf32> to vector<16x32xf32>
    %30 = arith.maximumf %28, %29 : vector<16x32xf32>
    %31 = vector.extract_strided_slice %17 {offsets = [112, 0], sizes = [16, 32], strides = [1, 1]} : vector<128x32xf32> to vector<16x32xf32>
    %32 = arith.maximumf %30, %31 : vector<16x32xf32>
    %c0_i32 = arith.constant 0 : i32
    %33 = arith.cmpi eq, %arg2, %c0_i32 : i32
    %34 = arith.extui %33 : i1 to i32
    %c0_i32_14 = arith.constant 0 : i32
    %35 = arith.cmpi ne, %34, %c0_i32_14 : i32
    scf.if %35 {
      %c0_17 = arith.constant 0 : index
      %c0_18 = arith.constant 0 : index
      %c0_19 = arith.constant 0 : index
      %39 = vector.load %arg8[%c0_17, %c0_18, %c0_19] : memref<1x16x32xf32, #tpu.memory_space<vmem>>, vector<1x16x32xf32>
      %40 = vector.shape_cast %39 : vector<1x16x32xf32> to vector<16x32xf32>
      %41 = vector.shape_cast %32 : vector<16x32xf32> to vector<1x16x32xf32>
      tpu.vector_store %arg8[%c0_17, %c0_18, %c0_19], %41 {strides = array<i32>} : memref<1x16x32xf32, #tpu.memory_space<vmem>>, vector<1x16x32xf32>,
    } else {
    }
    %c0_i32_15 = arith.constant 0 : i32
    %36 = arith.cmpi ne, %arg2, %c0_i32_15 : i32
    %37 = arith.extui %36 : i1 to i32
    %c0_i32_16 = arith.constant 0 : i32
    %38 = arith.cmpi ne, %37, %c0_i32_16 : i32
    scf.if %38 {
      %c0_17 = arith.constant 0 : index
      %c0_18 = arith.constant 0 : index
      %c0_19 = arith.constant 0 : index
      %39 = vector.load %arg8[%c0_17, %c0_18, %c0_19] : memref<1x16x32xf32, #tpu.memory_space<vmem>>, vector<1x16x32xf32>
      %40 = vector.shape_cast %39 : vector<1x16x32xf32> to vector<16x32xf32>
      %41 = arith.maximumf %40, %32 : vector<16x32xf32>
      %c0_20 = arith.constant 0 : index
      %c0_21 = arith.constant 0 : index
      %c0_22 = arith.constant 0 : index
      %42 = vector.load %arg8[%c0_20, %c0_21, %c0_22] : memref<1x16x32xf32, #tpu.memory_space<vmem>>, vector<1x16x32xf32>
      %43 = vector.shape_cast %42 : vector<1x16x32xf32> to vector<16x32xf32>
      %44 = vector.shape_cast %41 : vector<16x32xf32> to vector<1x16x32xf32>
      tpu.vector_store %arg8[%c0_20, %c0_21, %c0_22], %44 {strides = array<i32>} : memref<1x16x32xf32, #tpu.memory_space<vmem>>, vector<1x16x32xf32>,
    } else {
    }
    return
  }
  func.func @transform_0(%arg0: i32, %arg1: i32, %arg2: i32) -> (i32, i32, i32, i32) {
    %c0_i32 = arith.constant 0 : i32
    %c0_i32_0 = arith.constant 0 : i32
    return %arg0, %arg2, %arg1, %c0_i32 : i32, i32, i32, i32
  }
  func.func @transform_1(%arg0: i32, %arg1: i32, %arg2: i32) -> (i32, i32) {
    %c0_i32 = arith.constant 0 : i32
    %c0_i32_0 = arith.constant 0 : i32
    %c0_i32_1 = arith.constant 0 : i32
    return %c0_i32, %c0_i32_0 : i32, i32
  }
  func.func @transform_2(%arg0: i32, %arg1: i32, %arg2: i32) -> (i32, i32) {
    %c0_i32 = arith.constant 0 : i32
    %c0_i32_0 = arith.constant 0 : i32
    %c0_i32_1 = arith.constant 0 : i32
    return %c0_i32, %c0_i32_0 : i32, i32
  }
  func.func @transform_3(%arg0: i32, %arg1: i32, %arg2: i32) -> (i32, i32) {
    %c0_i32 = arith.constant 0 : i32
    %c0_i32_0 = arith.constant 0 : i32
    %c0_i32_1 = arith.constant 0 : i32
    return %c0_i32, %c0_i32_0 : i32, i32
  }
  func.func @transform_4(%arg0: i32, %arg1: i32, %arg2: i32) -> (i32, i32) {
    %c0_i32 = arith.constant 0 : i32
    %c0_i32_0 = arith.constant 0 : i32
    %c0_i32_1 = arith.constant 0 : i32
    return %c0_i32, %c0_i32_0 : i32, i32
  }
  func.func @transform_5(%arg0: i32, %arg1: i32, %arg2: i32) -> (i32, i32, i32) {
    %c0_i32 = arith.constant 0 : i32
    %c0_i32_0 = arith.constant 0 : i32
    return %arg0, %arg1, %c0_i32 : i32, i32, i32
  }
}

</mosaic_0001>

<bundles_post_ra>
// kernel: tpu_custom_call.1
= control target key start
LH: loop header
LB: loop body
LE: loop exit
PB: predicated region body
PF: predicated region fallthrough
CT: control target
= control target key end

     0   :  { %10 = vsyncpa [#allocation3], 0  ;;  %s1208_s0 = inlined_call_operand.vmem [shape: bf16[2,8,16,7], index: 0, kind: input, shape index: {}]   ;;  %s1209_s1 = inlined_call_operand.vmem [shape: bf16[7,16], index: 1, kind: input, shape index: {}]   ;;  %s1210_s2 = inlined_call_operand.vmem [shape: f32[1,16], index: 2, kind: input, shape index: {}]   ;;  %s1211_s3 = inlined_call_operand.vmem [shape: bf16[16,32], index: 3, kind: input, shape index: {}]   ;;  %s1212_s4 = inlined_call_operand.vmem [shape: f32[1,32], index: 4, kind: input, shape index: {}]   ;;  %s1213_s5 = inlined_call_operand.hbm [shape: f32[2,16,32], index: 5, kind: output, shape index: {}]  }
   0x1   :  { %12 = vsyncpa [#allocation3 + $0x1], 0  ;;  %s1062_s18 = smov 0   ;;  %s1064_s19 = smov 0  }
   0x2   :  { %s1066_s20 = smov 0   ;;  %s1068_s21 = smov 0  }
   0x3   :  { %s1070_s22 = smov 0   ;;  %s1072_s23 = smov 0  }
   0x4 LB: > { %s787_s24 = sadd.s32 4294967295, %s1026_s23   ;;  %s788_s25 = sadd.s32 4294967294, %s1026_s23   ;;  %s1026_s23 = sphi %s1072_s23, %s18_s23   ;;  %s1022_s22 = sphi %s1070_s22, %s1220_s22   ;;  %s1018_s21 = sphi %s1068_s21, %s1219_s21   ;;  %s1014_s20 = sphi %s1066_s20, %s1218_s20   ;;  %s1010_s19 = sphi %s1064_s19, %s1217_s19   ;;  %s1006_s18 = sphi %s1062_s18, %s1216_s18  }
   0x5   : > { %s37_s26 = sadd.s32 1, %s1022_s22  ;;  %s160_s27 = sadd.s32 1, %s1014_s20 }
   0x6   : > { %p39_p0 = scmp.ge.s32.totalorder %s37_s26, 2  ;;  %p170_p1 = scmp.ne.s32.totalorder %s1014_s20, %s1010_s19 }
   0x7   : > { %p171_p2 = scmp.eq.s32.totalorder %s787_s24, 1  ;;  %p176_p3 = scmp.ne.s32.totalorder %s1010_s19, %s1006_s18 }
   0x8   : > { %s1222_s26 = smov (%p39_p0, %s37_s26), 0  ;;  %p177_p5 = scmp.eq.s32.totalorder %s788_s25, 1 }
   0x9   : > { %p1102_p4 = por %p171_p2, %p170_p1  ;;  %s155_s29 = ssub.s32 %s1022_s22, %s1222_s26 }
   0xa   : > { %p791_p6 = scmp.ge.s32.totalorder %s1026_s23, 1  ;;  %p158_p7 = scmp.eq.s32.totalorder %s155_s29, 0 }
   0xb   : > { %p1109_p8 = por %p177_p5, %p176_p3  ;;  %p226_p9 = scmp.lt.s32.totalorder %s1026_s23, 3 }
   0xc   : > { %s1115_s6 = scalar_select %p158_p7, %s1014_s20, %s160_s27  }
   0xd   : > { %p227_p10 = pnand %p791_p6, %p226_p9 }
   0xe   : > { %p265_p11 = scmp.lt.s32.totalorder (!%p227_p10), %s1018_s21, 1  ;;  %s260_s27 = sand.u32 (!%p227_p10), 1, %s1010_s19  }
   0xf   : > { %230 = sbr.rel (%p227_p10) target bundleno = 480 (0x1e0), region = 40  ;;  %s792_s29 = sshll.u32 (!%p227_p10), %s260_s27, 4 }
  0x10   : > { %s828_s7 = sshll.u32 (!%p227_p10), %s1018_s21, 8  ;;  %s262_s8 = scalar_lea.vmem (!%p227_p10), [#allocation2], %s792_s29 }
  0x11   : > { %s1157_s12 = scalar_lea.hbm (!%p227_p10), %s1213_s5, %s828_s7  ;;  %s1029_s14 = smov (!%p227_p10), [#allocation2]  }
  0x12   : > { %s954_s15 = sshll.u32 (!%p227_p10), %s1029_s14, 4  ;;  %s955_s15 = int_to_ptr.vmem [resolvable:$false] %s954_s15 }
  0x13   : > { %s956_s16 = scalar_lea.vmem (!%p227_p10), %s955_s15, 512 }
  0x14   : > { %v297_v0 = vld [vmem:[%s1209_s1] sm:$0xf]  ;;  %vm370_vm0 = vcmask 1042432   ;;  %vm371_vm1 = vcmask 1043456   ;;  %v1028_v1 = vmov 65535   ;;  %s266_s9 = scalar_select %p265_p11, %s1018_s21, 1 }
  0x15   : > { %v372_v2 = vsel %vm370_vm0, 4294967295, %v1028_v1  ;;  %vm345_vm2 = vcmask 56320   ;;  %v949_v13 = vld [vmem:[%s1211_s3] sm:$0xff]   ;;  %vm513_vm3 = vcmask 130048   ;;  %vm669_vm4 = vcmask 261120  }
  0x16   : > { %v373_v3 = vsel %vm371_vm1, %v372_v2, 0  ;;  %s827_s10 = sshll.u32 %s266_s9, 6  ;;  %865 = vmatprep.subr.bf16.mxu1 %v949_v13  ;;  %v795_v16 = vld [vmem:[%s1210_s2] ss:$0 sm:$0xff]  ;;  %s699_s9 = sshll.u32 %s262_s8, 4  ;;  %s1159_s9 = int_to_ptr.vmem [resolvable:$true] %s699_s9 }
  0x17   : > { %v375_v4 = vand.u32 %v373_v3, %v297_v0  ;;  %s276_s13 = scalar_lea.vmem %s1208_s0, %s827_s10  ;;  %866 = vmatpush3.bf16.msra.mxu1 %v949_v13  ;;  %s950_s21 = scalar_lea.vmem %s1159_s9, 256 }
  0x18   : > { %v941_v5 = vld [vmem:[%s276_s13] sm:$0xff]   ;;  %v942_v6 = vld [vmem:[%s276_s13 + $0x8] sm:$0xff]   ;;  %v943_v7 = vld [vmem:[%s276_s13 + $0x10] sm:$0xff]   ;;  %p951_p12 = scmp.ne.s32.totalorder %s1159_s9, %s950_s21  ;;  %p957_p1 = scmp.lt.s32.totalorder %s1159_s9, %s955_s15 }
  0x19   : > { %847 = vmatprep.subr.bf16.mxu0 %v375_v4  ;;  %849 = vmatprep.mubr.msk.bf16.mxu0 %vm345_vm2, %v941_v5  ;;  %v944_v8 = vld [vmem:[%s276_s13 + $0x18] sm:$0xff]   ;;  %v945_v9 = vld [vmem:[%s276_s13 + $0x20] sm:$0xff]   ;;  %v946_v10 = vld [vmem:[%s276_s13 + $0x28] sm:$0xff]   ;;  %p958_p2 = scmp.lt.s32.totalorder %s956_s16, %s950_s21 }
  0x1a   : > { %848 = vmatpush3.bf16.msra.mxu0 %v375_v4  ;;  %v947_v11 = vld [vmem:[%s276_s13 + $0x30] sm:$0xff]   ;;  %v948_v12 = vld [vmem:[%s276_s13 + $0x38] sm:$0xff]   ;;  %s1163_s13 = scalar_lea.sflag [#allocation3], %s260_s27  ;;  %p952_p13 = pnand %p951_p12, %p1102_p4 }
  0x1b   : > { %p959_p3 = por %p958_p2, %p957_p1 }
  0x1c   : > { %p953_p0 = pneg %p952_p13 }
  0x1d   : > { %850 = vmatmul.mubr.msk.bf16.vlgmr.msra.gmra.mxu0 %vm345_vm2, %v942_v6 }
  0x1e   : > { %853 = vmatprep.mubr.msk.bf16.mxu0 %vm345_vm2, %v943_v7  ;;  %p960_p5 = pnand %p959_p3, %p953_p0 }
  0x25   : > { %854 = vmatmul.mubr.msk.bf16.gmra.mxu0 %vm345_vm2, %v944_v8 }
  0x26   : > { %857 = vmatprep.mubr.msk.bf16.mxu0 %vm345_vm2, %v945_v9 }
  0x2d   : > { %858 = vmatmul.mubr.msk.bf16.gmra.mxu0 %vm345_vm2, %v946_v10 }
  0x2e   : > { %861 = vmatprep.mubr.msk.bf16.mxu0 %vm345_vm2, %v947_v11  ;;  %v812_v11 = vld [vmem:[%s1212_s4] ss:$0 sm:$0xff] }
  0x35   : > { %862 = vmatmul.mubr.msk.bf16.gmra.mxu0 %vm345_vm2, %v948_v12 }
  0xdd   : > { %v851_v14 = vpop.f32.mrf.mxu0 }
  0xde   : > { %v420_v20 = vadd.f32 %v851_v14, %v795_v16 }
  0xdf   : > { %v411_v15 = vpop.f32.mrf.mxu0 }
  0xe0   : > { %v412_v18 = vadd.f32 %v795_v16, %v411_v15  ;;  %v476_v27 = vmax.f32 %v420_v20, 0.0 }
  0xe1   : > { %v852_v17 = vpop.f32.mrf.mxu0 }
  0xe2   : > { %v423_v19 = vadd.f32 %v852_v17, %v795_v16  ;;  %v474_v25 = vmax.f32 %v412_v18, 0.0 }
  0xe3   : > { %v414_v21 = vpop.f32.mrf.mxu0 }
  0xe4   : > { %v415_v22 = vadd.f32 %v795_v16, %v414_v21  ;;  %v477_v23 = vmax.f32 %v423_v19, 0.0 }
  0xe5   : > { %v855_v24 = vpop.f32.mrf.mxu0 }
  0xe6   : > { %v475_v26 = vmax.f32 %v415_v22, 0.0  ;;  %v491_v30 = vpack.c.bf16 %v477_v23, %v476_v27  ;;  %v436_v34 = vadd.f32 %v855_v24, %v795_v16 }
  0xe7   : > { %v427_v28 = vpop.f32.mrf.mxu0 }
  0xe8   : > { %v490_v29 = vpack.c.bf16 %v475_v26, %v474_v25  ;;  %v428_v32 = vadd.f32 %v795_v16, %v427_v28  ;;  %v480_v41 = vmax.f32 %v436_v34, 0.0 }
  0xe9   : > { %v856_v31 = vpop.f32.mrf.mxu0 }
  0xea   : > { %v439_v33 = vadd.f32 %v856_v31, %v795_v16  ;;  %867 = vmatprep.mubr.msk.bf16.mxu1 %vm513_vm3, %v490_v29  ;;  %v478_v39 = vmax.f32 %v428_v32, 0.0 }
  0xeb   : > { %v430_v35 = vpop.f32.mrf.mxu0  ;;  %868 = vmatmul.mubr.msk.bf16.vlgmr.msra.gmra.mxu1 %vm513_vm3, %v491_v30 }
  0xec   : > { %v431_v36 = vadd.f32 %v795_v16, %v430_v35  ;;  %v481_v37 = vmax.f32 %v439_v33, 0.0 }
  0xed   : > { %v859_v38 = vpop.f32.mrf.mxu0 }
  0xee   : > { %v479_v40 = vmax.f32 %v431_v36, 0.0  ;;  %v493_v44 = vpack.c.bf16 %v481_v37, %v480_v41  ;;  %v452_v48 = vadd.f32 %v859_v38, %v795_v16 }
  0xef   : > { %v443_v42 = vpop.f32.mrf.mxu0 }
  0xf0   : > { %v492_v43 = vpack.c.bf16 %v479_v40, %v478_v39  ;;  %v444_v46 = vadd.f32 %v795_v16, %v443_v42  ;;  %v484_v55 = vmax.f32 %v452_v48, 0.0 }
  0xf1   : > { %v860_v45 = vpop.f32.mrf.mxu0 }
  0xf2   : > { %v455_v47 = vadd.f32 %v860_v45, %v795_v16  ;;  %871 = vmatprep.mubr.msk.bf16.mxu1 %vm513_vm3, %v492_v43  ;;  %v482_v53 = vmax.f32 %v444_v46, 0.0 }
  0xf3   : > { %v446_v49 = vpop.f32.mrf.mxu0  ;;  %872 = vmatmul.mubr.msk.bf16.gmra.mxu1 %vm513_vm3, %v493_v44 }
  0xf4   : > { %v447_v50 = vadd.f32 %v795_v16, %v446_v49  ;;  %v485_v51 = vmax.f32 %v455_v47, 0.0 }
  0xf5   : > { %v863_v52 = vpop.f32.mrf.mxu0 }
  0xf6   : > { %v483_v54 = vmax.f32 %v447_v50, 0.0  ;;  %v495_v58 = vpack.c.bf16 %v485_v51, %v484_v55  ;;  %v468_v62 = vadd.f32 %v863_v52, %v795_v16 }
  0xf7   : > { %v459_v56 = vpop.f32.mrf.mxu0 }
  0xf8   : > { %v494_v57 = vpack.c.bf16 %v483_v54, %v482_v53  ;;  %v460_v60 = vadd.f32 %v795_v16, %v459_v56  ;;  %v488_v4 = vmax.f32 %v468_v62, 0.0 }
  0xf9   : > { %v864_v59 = vpop.f32.mrf.mxu0 }
  0xfa   : > { %v471_v61 = vadd.f32 %v864_v59, %v795_v16  ;;  %875 = vmatprep.mubr.msk.bf16.mxu1 %vm513_vm3, %v494_v57  ;;  %v486_v2 = vmax.f32 %v460_v60, 0.0 }
  0xfb   : > { %v462_v63 = vpop.f32.mrf.mxu0  ;;  %876 = vmatmul.mubr.msk.bf16.gmra.mxu1 %vm513_vm3, %v495_v58 }
  0xfc   : > { %v463_v0 = vadd.f32 %v795_v16, %v462_v63  ;;  %v489_v1 = vmax.f32 %v471_v61, 0.0 }
  0xfe   : > { %v487_v3 = vmax.f32 %v463_v0, 0.0  ;;  %v497_v6 = vpack.c.bf16 %v489_v1, %v488_v4 }
 0x100   : > { %v496_v5 = vpack.c.bf16 %v487_v3, %v486_v2 }
 0x102   : > { %879 = vmatprep.mubr.msk.bf16.mxu1 %vm513_vm3, %v496_v5 }
 0x103   : > { %880 = vmatmul.mubr.msk.bf16.gmra.mxu1 %vm513_vm3, %v497_v6 }
 0x1ab   : > { %v869_v7 = vpop.f32.mrf.mxu1 }
 0x1ac   : > { %v581_v15 = vadd.f32 %v869_v7, %v812_v11 }
 0x1ad   : > { %v572_v8 = vpop.f32.mrf.mxu1 }
 0x1ae   : > { %v573_v13 = vadd.f32 %v812_v11, %v572_v8  ;;  %v637_v21 = vmax.f32 %v581_v15, 0.0 }
 0x1af   : > { %v870_v9 = vpop.f32.mrf.mxu1 }
 0x1b0   : > { %v635_v18 = vmax.f32 %v573_v13, 0.0  ;;  %v584_v22 = vadd.f32 %v870_v9, %v812_v11 }
 0x1b1   : > { %v575_v10 = vpop.f32.mrf.mxu1 }
 0x1b2   : > { %v576_v19 = vadd.f32 %v812_v11, %v575_v10  ;;  %v651_v26 = vmax.f32 %v635_v18, %v637_v21  ;;  %v638_v30 = vmax.f32 %v584_v22, 0.0 }
 0x1b3   : > { %v873_v12 = vpop.f32.mrf.mxu1 }
 0x1b4   : > { %v636_v27 = vmax.f32 %v576_v19, 0.0  ;;  %v597_v28 = vadd.f32 %v873_v12, %v812_v11 }
 0x1b5   : > { %v588_v14 = vpop.f32.mrf.mxu1 }
 0x1b6   : > { %v589_v16 = vadd.f32 %v812_v11, %v588_v14  ;;  %v652_v35 = vmax.f32 %v636_v27, %v638_v30  ;;  %v641_v36 = vmax.f32 %v597_v28, 0.0 }
 0x1b7   : > { %v874_v17 = vpop.f32.mrf.mxu1 }
 0x1b8   : > { %v639_v23 = vmax.f32 %v589_v16, 0.0  ;;  %v600_v37 = vadd.f32 %v874_v17, %v812_v11 }
 0x1b9   : > { %v591_v20 = vpop.f32.mrf.mxu1 }
 0x1ba   : > { %v592_v24 = vadd.f32 %v812_v11, %v591_v20  ;;  %v653_v31 = vmax.f32 %v651_v26, %v639_v23  ;;  %v642_v45 = vmax.f32 %v600_v37, 0.0 }
 0x1bb   : > { %v877_v25 = vpop.f32.mrf.mxu1 }
 0x1bc   : > { %v640_v32 = vmax.f32 %v592_v24, 0.0  ;;  %v613_v41 = vadd.f32 %v877_v25, %v812_v11  ;;  %v655_v42 = vmax.f32 %v653_v31, %v641_v36 }
 0x1bd   : > { %v604_v29 = vpop.f32.mrf.mxu1 }
 0x1be   : > { %v605_v33 = vadd.f32 %v812_v11, %v604_v29  ;;  %v654_v40 = vmax.f32 %v652_v35, %v640_v32  ;;  %v645_v50 = vmax.f32 %v613_v41, 0.0 }
 0x1bf   : > { %v878_v34 = vpop.f32.mrf.mxu1 }
 0x1c0   : > { %v643_v38 = vmax.f32 %v605_v33, 0.0  ;;  %v616_v48 = vadd.f32 %v878_v34, %v812_v11  ;;  %v656_v51 = vmax.f32 %v654_v40, %v642_v45 }
 0x1c1   : > { %v607_v39 = vpop.f32.mrf.mxu1 }
 0x1c2   : > { %v608_v43 = vadd.f32 %v812_v11, %v607_v39  ;;  %v657_v46 = vmax.f32 %v655_v42, %v643_v38  ;;  %v646_v58 = vmax.f32 %v616_v48, 0.0 }
 0x1c3   : > { %v881_v44 = vpop.f32.mrf.mxu1 }
 0x1c4   : > { %v644_v47 = vmax.f32 %v608_v43, 0.0  ;;  %v629_v52 = vadd.f32 %v881_v44, %v812_v11  ;;  %v659_v57 = vmax.f32 %v657_v46, %v645_v50 }
 0x1c5   : > { %v620_v49 = vpop.f32.mrf.mxu1 }
 0x1c6   : > { %v621_v53 = vadd.f32 %v812_v11, %v620_v49  ;;  %v658_v55 = vmax.f32 %v656_v51, %v644_v47  ;;  %v649_v60 = vmax.f32 %v629_v52, 0.0 }
 0x1c7   : > { %v882_v54 = vpop.f32.mrf.mxu1 }
 0x1c8   : > { %v647_v56 = vmax.f32 %v621_v53, 0.0  ;;  %v632_v62 = vadd.f32 %v882_v54, %v812_v11  ;;  %v660_v2 = vmax.f32 %v658_v55, %v646_v58 }
 0x1c9   : > { %v623_v59 = vpop.f32.mrf.mxu1 }
 0x1ca   : > { %v661_v61 = vmax.f32 %v659_v57, %v647_v56  ;;  %v624_v63 = vadd.f32 %v812_v11, %v623_v59  ;;  %v650_v3 = vmax.f32 %v632_v62, 0.0 }
 0x1cc   : > { %v663_v0 = vmax.f32 %v661_v61, %v649_v60  ;;  %v648_v1 = vmax.f32 %v624_v63, 0.0 }
 0x1ce   : > { %670 = vst.msk [vmem:[%s262_s8] sm:$0xff] %vm669_vm4, %v663_v0  ;;  %v662_v4 = vmax.f32 %v660_v2, %v648_v1 }
 0x1d0   : > { %v664_v5 = vmax.f32 %v662_v4, %v650_v3 }
 0x1d2   : > { %671 = vst.msk [vmem:[%s262_s8 + $0x8] sm:$0xff] %vm669_vm4, %v664_v5 }
 0x1d3   : > { %963 = shalt.err (!%p960_p5)
}
 0x1d4   : > { %s964_s17 = scalar_lea.hbm %s1157_s12, 256  ;;  %s968_s27 = scalar_lea.hbm %s1213_s5, 512 }
 0x1d5   : > { %p965_p6 = scmp.ne.s32.totalorder %s1157_s12, %s964_s17  ;;  %p969_p10 = scmp.lt.s32.totalorder %s1157_s12, %s1213_s5 }
 0x1d6   : > { %p970_p11 = scmp.lt.s32.totalorder %s968_s27, %s964_s17 }
 0x1d7   : > { %p966_p7 = pnand %p965_p6, %p1102_p4 }
 0x1d8   : > { %p971_p12 = por %p970_p11, %p969_p10 }
 0x1d9   : > { %p967_p9 = pneg %p966_p7 }
 0x1db   : > { %p972_p13 = pnand %p971_p12, %p967_p9 }
 0x1dd   : > { %975 = shalt.err (!%p972_p13)
}
 0x1de   : > { %s1030_s8 = smov 128   ;;  %s1031_s10 = smov 8  }
 0x1df   : > { %883 = dma.vmem_to_hbm [thread:$0]  (%p1102_p4), %s1159_s9, 256, %s1157_s12, %s1163_s13, %s1030_s8, %s1030_s8, %s1031_s10  }
 0x1e0 PF: > { %p889_p0 = scmp.ge.s32.totalorder %s1026_s23, 2  ;;  %s714_s11 = sand.u32 1, %s1006_s18  }
 0x1e1   : > { %s715_s21 = scalar_lea.sflag [#allocation3], %s714_s11 }
 0x1e2   : > { %p886_p1 = pnand %p889_p0, %p1109_p8 }
 0x1e4   : > { %p887_p2 = pneg %p886_p1 }
 0x1e6   : > { %1001 = dma.done.wait (%p887_p2), %s715_s21, 256  }
 0x1e7   : > { %1003 = vsyncadd (%p887_p2), %s715_s21, 4294967040  ;;  %s18_s23 = sadd.s32 1, %s1026_s23   ;;  %s1216_s18 = smov %s1010_s19 }
 0x1e8   : > { %p15_p3 = scmp.ge.s32.totalorder %s18_s23, 4   ;;  %s1217_s19 = smov %s1014_s20 }
 0x1e9   : > { %s1218_s20 = smov %s1115_s6  ;;  %s1219_s21 = smov %s1022_s22 }
 0x1ea   : > { %s1220_s22 = smov %s1222_s26  ;;  %17 = sbr.rel (!%p15_p3) target bundleno = 4 (0x4), region = 83 }
 0x1ef   :  { %720 = vsyncpa [#allocation3], 1 }
 0x1f0   :  { %722 = vsyncpa [#allocation3 + $0x1], 1 }

</bundles_post_ra>
